<compile_context>
chip_gen: v5e
topology: v5e:2x2
jax: 0.10.0
libtpu: 0.0.40
codegen_flags: <defaults>
</compile_context>

<pallas_src>
import functools

import jax
import jax.numpy as jnp
from jax.experimental import pallas as pl
from jax.experimental.pallas import tpu as pltpu


def _rmsnorm_kernel(x_ref, w_ref, o_ref, *, eps):
    # x_ref: [TILE_ROWS, HIDDEN]   w_ref: [1, HIDDEN]   o_ref: [TILE_ROWS, HIDDEN]
    # Pass 1: sum-of-squares reduce. The fp32 cast's live range ends at the
    # XLU reduce, leaving only an [R,1] column live afterwards (halves peak
    # VMEM/vreg pressure for narrow input dtypes).
    xf = x_ref[...].astype(jnp.float32)
    mean_sq = jnp.mean(xf * xf, axis=-1, keepdims=True)      # VPU mul + XLU reduce -> [R,1]
    del xf
    norm = jnp.sqrt(mean_sq) + eps                           # matches torch: sqrt THEN + eps
    # Reciprocal only on the [R,1] column: EUP approx (free bundle slot) plus
    # one Newton-Raphson step to recover full fp32 accuracy.
    inv = pl.reciprocal(norm, approx=True)
    inv = inv * (2.0 - norm * inv)
    # Pass 2: re-read the (VMEM-resident) block for the scaled store.
    w = w_ref[...].astype(jnp.float32)                       # [1,H] broadcasts over rows
    o_ref[...] = (x_ref[...].astype(jnp.float32) * inv * w).astype(o_ref.dtype)


def _round_up(n, m):
    return ((n + m - 1) // m) * m


def _vmem_capacity_bytes():
    """Per-core VMEM capacity; falls back to the v7x 64 MiB floor (most conservative)."""
    try:
        cap = getattr(pltpu.get_tpu_info(), "vmem_capacity_bytes", None)
        if cap:
            return int(cap)
    except Exception:
        pass
    return 64 * 1024 * 1024


def llama_rmsnorm(x, weight, eps=1e-5, *, min_grid_steps=4):
    """x: [..., hidden]; weight: [hidden]."""
    orig_shape = x.shape
    hidden = orig_shape[-1]
    rows = 1
    for d in orig_shape[:-1]:
        rows *= d
    x2d = x.reshape(rows, hidden)
    w2d = weight.reshape(1, hidden)

    itemsize = jnp.dtype(x.dtype).itemsize
    # Sublane packing per dtype: 8 rows (fp32), 16 (bf16/fp16), 32 (int8/fp8).
    sublane = max(8, 32 // itemsize)

    # --- VMEM accounting (per row of a block) --------------------------------
    #   2 input buffers + 2 output buffers (double-buffered pipeline)
    # + ~2 fp32 [R,H] in-kernel intermediates (cast copy of x, scaled product)
    bytes_per_row = 4 * hidden * itemsize + 2 * hidden * 4

    # Chip-derived block budget: ~1/3 of per-core VMEM, clamped to [16, 40] MiB.
    # v7x (64 MiB/TC) keeps headroom; v5e/v6e (128 MiB) get larger tiles.
    vmem_cap = _vmem_capacity_bytes()
    block_budget = min(max(vmem_cap // 3, 16 * 1024 * 1024), 40 * 1024 * 1024)

    cap_by_vmem = max(sublane, (block_budget // bytes_per_row) // sublane * sublane)
    # Keep at least `min_grid_steps` grid steps when rows allow: >=2 steps per
    # TC on v7x megacore, and enough steps for DMA/compute overlap everywhere.
    cap_by_steps = max(sublane, _round_up(pl.cdiv(rows, min_grid_steps), sublane))
    row_tile = min(cap_by_vmem, cap_by_steps, _round_up(rows, sublane))
    grid = (pl.cdiv(rows, row_tile),)  # partial last block: per-row math, OOB writes masked

    # Scoped VMEM limit: cover buffers + fp32 intermediates + weight + headroom,
    # clamped to <=75% of per-core VMEM (keeps compiler scratch room on v7x).
    need = row_tile * bytes_per_row + 2 * hidden * itemsize + (4 << 20)
    vmem_limit = min(max(need, 16 << 20), (vmem_cap * 3) // 4)

    # NOTE: hidden should be a multiple of 128 for unmasked (lane-dense) stores;
    # real Llama hidden sizes (4096/5120/8192) are. Tiny demo hidden=32 just
    # takes masked stores, which is fine at that size.
    kernel = functools.partial(_rmsnorm_kernel, eps=eps)
    out = pl.pallas_call(
        kernel,
        out_shape=jax.ShapeDtypeStruct((rows, hidden), x.dtype),
        grid_spec=pltpu.PrefetchScalarGridSpec(
            num_scalar_prefetch=0,
            grid=grid,
            in_specs=[
                pl.BlockSpec((row_tile, hidden), lambda i: (i, 0)),
                pl.BlockSpec((1, hidden), lambda i: (0, 0)),
            ],
            out_specs=pl.BlockSpec((row_tile, hidden), lambda i: (i, 0)),
        ),
        compiler_params=pltpu.CompilerParams(
            dimension_semantics=("parallel",),   # shards the row grid across TCs on v7x
            vmem_limit_bytes=int(vmem_limit),
        ),
    )(x2d, w2d)

    return out.reshape(orig_shape)


if __name__ == "__main__":
    key = jax.random.PRNGKey(0)
    batch, seq, hidden = 2, 8, 32

    x = jax.random.normal(key, (batch, seq, hidden), dtype=jnp.float32)
    # Deterministic parameter init matching nn.Parameter(torch.ones(hidden_size)).
    weight = jnp.ones((hidden,), dtype=jnp.float32)
    eps = 1e-5

    out = llama_rmsnorm(x, weight, eps)
    out = jax.block_until_ready(out)

    # Pure-JAX reference (same math as the PyTorch forward).
    norm = jnp.sqrt(jnp.mean(x * x, axis=-1, keepdims=True)) + eps
    ref = x / norm * weight
    assert out.shape == x.shape and out.dtype == x.dtype
    assert jnp.allclose(out, ref, atol=1e-5, rtol=1e-5), "mismatch vs reference"

    print("KERNEL_OK")
</pallas_src>

<mosaic_0001>
module attributes {stable_mosaic.version = 11 : i64} {
  func.func @_rmsnorm_kernel(%arg0: i32, %arg1: memref<8x32xf32, #tpu.memory_space<vmem>>, %arg2: memref<1x32xf32, #tpu.memory_space<vmem>>, %arg3: memref<8x32xf32, #tpu.memory_space<vmem>>) attributes {dimension_semantics = [#tpu.dimension_semantics<parallel>], iteration_bounds = array<i64: 2>, scalar_prefetch = 0 : i64, scratch_operands = 0 : i64, tpu.core_type = #tpu.core_type<tc>, window_params = [{transform_indices = @transform_0, window_bounds = array<i64: 8, 32>}, {pipeline_mode = #tpu.pipeline_mode<synchronous>, transform_indices = @transform_1, window_bounds = array<i64: 1, 32>}, {transform_indices = @transform_2, window_bounds = array<i64: 8, 32>}]} {
    %c0 = arith.constant 0 : index
    %c0_0 = arith.constant 0 : index
    %0 = vector.load %arg1[%c0, %c0_0] : memref<8x32xf32, #tpu.memory_space<vmem>>, vector<8x32xf32>
    %1 = arith.mulf %0, %0 : vector<8x32xf32>
    %cst = arith.constant dense<0.000000e+00> : vector<8xf32>
    %2 = vector.multi_reduction <add>, %1, %cst [1] : vector<8x32xf32> to vector<8xf32>
    %3 = vector.shape_cast %2 : vector<8xf32> to vector<8x1xf32>
    %cst_1 = arith.constant 3.200000e+01 : f32
    %4 = vector.broadcast %cst_1 : f32 to vector<8x1xf32>
    %5 = arith.divf %3, %4 : vector<8x1xf32>
    %6 = math.sqrt %5 : vector<8x1xf32>
    %cst_2 = arith.constant 9.99999974E-6 : f32
    %7 = vector.broadcast %cst_2 : f32 to vector<8x1xf32>
    %8 = arith.addf %6, %7 : vector<8x1xf32>
    %9 = tpu.reciprocal %8 {approx = true} : vector<8x1xf32> -> vector<8x1xf32>
    %10 = arith.mulf %8, %9 : vector<8x1xf32>
    %cst_3 = arith.constant 2.000000e+00 : f32
    %11 = vector.broadcast %cst_3 : f32 to vector<8x1xf32>
    %12 = arith.subf %11, %10 : vector<8x1xf32>
    %13 = arith.mulf %9, %12 : vector<8x1xf32>
    %c0_4 = arith.constant 0 : index
    %c0_5 = arith.constant 0 : index
    %14 = vector.load %arg2[%c0_4, %c0_5] : memref<1x32xf32, #tpu.memory_space<vmem>>, vector<1x32xf32>
    %c0_6 = arith.constant 0 : index
    %c0_7 = arith.constant 0 : index
    %15 = vector.load %arg1[%c0_6, %c0_7] : memref<8x32xf32, #tpu.memory_space<vmem>>, vector<8x32xf32>
    %16 = vector.broadcast %13 : vector<8x1xf32> to vector<8x32xf32>
    %17 = arith.mulf %15, %16 : vector<8x32xf32>
    %18 = vector.broadcast %14 : vector<1x32xf32> to vector<8x32xf32>
    %19 = arith.mulf %17, %18 : vector<8x32xf32>
    %c0_8 = arith.constant 0 : index
    %c0_9 = arith.constant 0 : index
    %20 = vector.load %arg3[%c0_8, %c0_9] : memref<8x32xf32, #tpu.memory_space<vmem>>, vector<8x32xf32>
    tpu.vector_store %arg3[%c0_8, %c0_9], %19 {strides = array<i32>} : memref<8x32xf32, #tpu.memory_space<vmem>>, vector<8x32xf32>,
    return
  }
  func.func @transform_0(%arg0: i32) -> (i32, i32) {
    %c0_i32 = arith.constant 0 : i32
    %c0_i32_0 = arith.constant 0 : i32
    return %arg0, %c0_i32 : i32, i32
  }
  func.func @transform_1(%arg0: i32) -> (i32, i32) {
    %c0_i32 = arith.constant 0 : i32
    %c0_i32_0 = arith.constant 0 : i32
    %c0_i32_1 = arith.constant 0 : i32
    return %c0_i32, %c0_i32_0 : i32, i32
  }
  func.func @transform_2(%arg0: i32) -> (i32, i32) {
    %c0_i32 = arith.constant 0 : i32
    %c0_i32_0 = arith.constant 0 : i32
    return %arg0, %c0_i32 : i32, i32
  }
}

</mosaic_0001>

<bundles_post_ra>
// kernel: tpu_custom_call.1
= control target key start
LH: loop header
LB: loop body
LE: loop exit
PB: predicated region body
PF: predicated region fallthrough
CT: control target
= control target key end

     0   :  { %7 = vsyncpa [#allocation3], 0  ;;  %s682_s0 = inlined_call_operand.hbm [shape: f32[16,32], index: 0, kind: input, shape index: {}]   ;;  %s683_s1 = inlined_call_operand.hbm [shape: f32[1,32], index: 1, kind: input, shape index: {}]   ;;  %s684_s2 = inlined_call_operand.hbm [shape: f32[16,32], index: 2, kind: output, shape index: {}]  }
   0x1   :  { %9 = vsyncpa [#allocation3 + $0x1], 0 }
   0x2   :  { %10 = vsyncpa [#allocation6], 0 }
   0x3   :  { %11 = vsyncpa [#allocation4], 0 }
   0x4   :  { %13 = vsyncpa [#allocation4 + $0x1], 0  ;;  %s538_s9 = smov 0   ;;  %s540_s10 = smov 0  }
   0x5   :  { %s542_s11 = smov 0   ;;  %s544_s12 = smov 0  }
   0x6 LB: > { %s559_s13 = sadd.s32 4294967295, %s519_s12   ;;  %s310_s14 = sadd.s32 4294967294, %s519_s12   ;;  %s519_s12 = sphi %s544_s12, %s694_s12   ;;  %s515_s11 = sphi %s542_s11, %s693_s11   ;;  %s511_s10 = sphi %s540_s10, %s692_s10   ;;  %s507_s9 = sphi %s538_s9, %s691_s9  }
   0x7   : > { %p39_p0 = scmp.ne.s32.totalorder %s511_s10, %s507_s9  ;;  %p40_p1 = scmp.eq.s32.totalorder %s559_s13, 0 }
   0x8   : > { %p84_p2 = scmp.eq.s32.totalorder %s559_s13, 1  ;;  %p90_p3 = scmp.eq.s32.totalorder %s310_s14, 1 }
   0x9   : > { %p568_p4 = por %p40_p1, %p39_p0  ;;  %p311_p5 = scmp.ge.s32.totalorder %s519_s12, 1 }
   0xa   : > { %p573_p6 = por %p90_p3, %p39_p0  ;;  %p97_p7 = scmp.lt.s32.totalorder %s519_s12, 3 }
   0xb   : > { %s109_s19 = sshll.u32 %s683_s1, 4  ;;  %s521_s21 = smov [#allocation5]   ;;  %s110_s19 = int_to_ptr.hbm [resolvable:$true] %s109_s19 }
   0xc   : > { %p581_p8 = pnand %p311_p5, %p97_p7  ;;  %s111_s22 = sshll.u32 %s521_s21, 4  ;;  %s112_s22 = int_to_ptr.vmem [resolvable:$true] %s111_s22 }
   0xd   : > { %s591_s23 = sadd.s32 1, %s519_s12   ;;  %s26_s24 = sadd.s32 1, %s515_s11 }
   0xe   : > { %p332_p10 = pneg %p581_p8  ;;  %s23_s25 = ssub.s32 %s519_s12, %s591_s23 }
   0xf   : > { %p24_p12 = scmp.eq.s32.totalorder %s23_s25, 0  ;;  %p33_p13 = scmp.ne.s32.totalorder %s515_s11, %s511_s10 }
  0x10   : > { %p333_p11 = pnand %p332_p10, %p40_p1  ;;  %p34_p0 = scmp.eq.s32.totalorder %s519_s12, 0 }
  0x11   : > { %s600_s26 = scalar_select %p24_p12, %s515_s11, %s26_s24  }
  0x12   : > { %335 = dma.hbm_to_vmem [thread:$0]  (!%p333_p11), %s110_s19, 16, %s112_s22, [#allocation6]  }
  0x13   : > { %p604_p3 = por %p84_p2, %p33_p13  ;;  %p345_p5 = scmp.lt.s32.totalorder %s519_s12, 2 }
  0x14   : > { %s122_s28 = sand.u32 1, %s515_s11   ;;  %s315_s29 = sshll.u32 %s519_s12, 3 }
  0x15   : > { %p35_p7 = por %p34_p0, %p33_p13  ;;  %s314_s30 = sshll.u32 %s122_s28, 3 }
  0x16   : > { %s130_s5 = scalar_lea.hbm %s682_s0, %s315_s29  ;;  %s126_s7 = scalar_lea.vmem [#allocation2], %s314_s30 }
  0x17   : > { %s132_s6 = sshll.u32 %s130_s5, 4  ;;  %s134_s8 = sshll.u32 %s126_s7, 4  ;;  %s133_s6 = int_to_ptr.hbm [resolvable:$true] %s132_s6  ;;  %s135_s8 = int_to_ptr.vmem [resolvable:$true] %s134_s8 }
  0x18   : > { %p614_p10 = pnand %p345_p5, %p35_p7  ;;  %s123_s17 = scalar_lea.sflag [#allocation3], %s122_s28 }
  0x19   : > { %s419_s18 = sshra.s32 %s133_s6, 4  ;;  %s426_s24 = scalar_lea.hbm %s682_s0, 16  ;;  %s420_s18 = int_to_ptr.hbm [resolvable:$true] %s419_s18 }
  0x1a   : > { %s421_s19 = scalar_lea.hbm %s420_s18, 8  ;;  %p423_p11 = pneg %p614_p10 }
  0x1b   : > { %p422_p2 = scmp.ne.s32.totalorder %s420_s18, %s421_s19  ;;  %p427_p0 = scmp.lt.s32.totalorder %s420_s18, %s682_s0 }
  0x1c   : > { %p428_p5 = scmp.lt.s32.totalorder %s426_s24, %s421_s19 }
  0x1d   : > { %p424_p12 = pnand %p423_p11, %p422_p2 }
  0x1e   : > { %p429_p7 = por %p428_p5, %p427_p0 }
  0x1f   : > { %p425_p13 = pneg %p424_p12 }
  0x21   : > { %p430_p9 = pnand %p429_p7, %p425_p13 }
  0x23   : > { %433 = shalt.err (!%p430_p9)
}
  0x24   : > { %339 = dma.hbm_to_vmem [thread:$0]  (!%p614_p10), %s133_s6, 128, %s135_s8, %s123_s17  }
  0x25   : > { %143 = sbr.rel (%p581_p8) target bundleno = 210 (0xd2), region = 28  ;;  %s631_s28 = sand.u32 (!%p581_p8), 1, %s511_s10  }
  0x26   : > { %s317_s30 = sshll.u32 (!%p581_p8), %s631_s28, 3  ;;  %s146_s3 = scalar_lea.sflag (!%p581_p8), [#allocation3], %s631_s28 }
  0x27   : > { %s149_s4 = scalar_lea.vmem (!%p581_p8), [#allocation2], %s317_s30 }
  0x2a   : > { %494 = dma.done.wait (%p568_p4), %s146_s3, 128  }
  0x2b   : > { %496 = vsyncadd (%p568_p4), %s146_s3, 4294967168 }
  0x2c   : > { %498 = dma.done.wait (%p40_p1), [#allocation6], 16  }
  0x2d   : > { %500 = vsyncadd (%p40_p1), [#allocation6], 4294967280  ;;  %v176_v0 = vld [vmem:[%s149_s4] sm:$0xff]  ;;  %vm178_vm0 = vcmask 261120   ;;  %v522_v3 = vmov 32.0   ;;  %s321_s15 = sshll.u32 %s559_s13, 3 }
  0x2e   : > { %v177_v1 = vmul.f32 %v176_v0, %v176_v0  ;;  %383 = vrcp.f32 %v522_v3  ;;  %s225_s6 = scalar_lea.hbm %s684_s2, %s321_s15  ;;  %v382_v27 = vld [vmem:[#allocation5] ss:$0 sm:$0xff]  ;;  %s175_s7 = scalar_lea.vmem [#allocation7], %s317_s30 }
  0x2f   : > { %s227_s8 = sshll.u32 %s175_s7, 4  ;;  %s229_s14 = sshll.u32 %s225_s6, 4  ;;  %s228_s8 = int_to_ptr.vmem [resolvable:$true] %s227_s8  ;;  %s230_s14 = int_to_ptr.hbm [resolvable:$true] %s229_s14 }
  0x30   : > { %v179_v2 = vsel %vm178_vm0, %v177_v1, 0.0  ;;  %s215_s13 = scalar_lea.sflag [#allocation4], %s631_s28  ;;  %s463_s17 = sshra.s32 %s230_s14, 4  ;;  %s464_s17 = int_to_ptr.hbm [resolvable:$true] %s463_s17 }
  0x31   : > { %180 = vadd.xlane.f32.xlu0 %v179_v2  ;;  %s465_s18 = scalar_lea.hbm %s464_s17, 8  ;;  %s469_s22 = scalar_lea.hbm %s684_s2, 16 }
  0x32   : > { %p466_p1 = scmp.ne.s32.totalorder %s464_s17, %s465_s18  ;;  %p470_p9 = scmp.lt.s32.totalorder %s464_s17, %s684_s2 }
  0x33   : > { %p471_p10 = scmp.lt.s32.totalorder %s469_s22, %s465_s18 }
  0x34   : > { %v384_v4 = vpop.eup %383  ;;  %p467_p4 = pnand %p466_p1, %p604_p3 }
  0x35   : > { %v183_v5 = vmul.f32 32.0, %v384_v4  ;;  %vm187_vm1 = vweird.f32 %v384_v4  ;;  %p472_p2 = por %p471_p10, %p470_p9 }
  0x36   : > { %p468_p8 = pneg %p467_p4 }
  0x37   : > { %v184_v6 = vsub.f32 1.0, %v183_v5 }
  0x38   : > { %p473_p11 = pnand %p472_p2, %p468_p8 }
  0x39   : > { %v185_v7 = vmul.f32 %v384_v4, %v184_v6 }
  0x3b   : > { %v186_v8 = vadd.f32 %v384_v4, %v185_v7 }
  0x3d   : > { %v188_v9 = vsel %vm187_vm1, %v384_v4, %v186_v8 }
  0xa4   : > { %v181_v10 = vpop.xlane.xlu0 %180 }
  0xa5   : > { %v189_v11 = vmul.f32 %v188_v9, %v181_v10 }
  0xa7   : > { %385 = vrsqrt.f32 %v189_v11  ;;  %vm197_vm2 = vcmp.eq.f32.partialorder %v189_v11, inf  ;;  %v200_v19 = vand.u32 2147483648, %v189_v11  ;;  %vm199_vm3 = vcmp.eq.f32.partialorder %v189_v11, 0.0 }
  0xad   : > { %v386_v12 = vpop.eup %385 }
  0xae   : > { %v191_v13 = vmul.f32 %v386_v12, %v189_v11 }
  0xb0   : > { %v192_v14 = vmul.f32 %v386_v12, %v191_v13 }
  0xb2   : > { %v193_v15 = vmul.f32 0.5, %v192_v14 }
  0xb4   : > { %v194_v16 = vsub.f32 1.5, %v193_v15 }
  0xb6   : > { %v195_v17 = vmul.f32 %v386_v12, %v194_v16 }
  0xb8   : > { %v196_v18 = vmul.f32 %v195_v17, %v189_v11 }
  0xba   : > { %v198_v20 = vsel %vm197_vm2, %v189_v11, %v196_v18 }
  0xbb   : > { %v201_v21 = vsel %vm199_vm3, %v200_v19, %v198_v20 }
  0xbc   : > { %v202_v22 = vadd.f32 1e-05, %v201_v21 }
  0xbe   : > { %387 = vrcp.f32 %v202_v22 }
  0xc4   : > { %v388_v23 = vpop.eup %387 }
  0xc5   : > { %v204_v24 = vmul.f32 %v388_v23, %v202_v22 }
  0xc7   : > { %v205_v25 = vsub.f32 2.0, %v204_v24 }
  0xc9   : > { %v206_v26 = vmul.f32 %v388_v23, %v205_v25 }
  0xcb   : > { %v208_v28 = vmul.f32 %v206_v26, %v176_v0 }
  0xcd   : > { %v212_v29 = vmul.f32 %v382_v27, %v208_v28 }
  0xcf   : > { %213 = vst.msk [vmem:[%s175_s7] sm:$0xff] %vm178_vm0, %v212_v29 }
  0xd0   : > { %476 = shalt.err (!%p473_p11)
}
  0xd1   : > { %330 = dma.vmem_to_hbm [thread:$0]  (%p604_p3), %s228_s8, 128, %s230_s14, %s215_s13  }
  0xd2 PF: > { %s241_s29 = sand.u32 1, %s507_s9   ;;  %p690_p12 = scmp.ge.s32.totalorder %s519_s12, 2 }
  0xd3   : > { %s242_s28 = scalar_lea.sflag [#allocation4], %s241_s29 }
  0xd4   : > { %p341_p13 = pnand %p690_p12, %p573_p6 }
  0xd6   : > { %p342_p0 = pneg %p341_p13 }
  0xd8   : > { %502 = dma.done.wait (%p342_p0), %s242_s28, 128  }
  0xd9   : > { %504 = vsyncadd (%p342_p0), %s242_s28, 4294967168  ;;  %p16_p5 = scmp.ge.s32.totalorder %s591_s23, 4   ;;  %s691_s9 = smov %s511_s10 }
  0xda   : > { %s692_s10 = smov %s515_s11  ;;  %s693_s11 = smov %s600_s26 }
  0xdb   : > { %s694_s12 = smov %s591_s23  ;;  %18 = sbr.rel (!%p16_p5) target bundleno = 6 (0x6), region = 77 }
  0xe0   :  { %248 = vsyncpa [#allocation3], 1 }
  0xe1   :  { %250 = vsyncpa [#allocation3 + $0x1], 1 }
  0xe2   :  { %251 = vsyncpa [#allocation6], 1 }
  0xe3   :  { %252 = vsyncpa [#allocation4], 1 }
  0xe4   :  { %254 = vsyncpa [#allocation4 + $0x1], 1 }

</bundles_post_ra>
